<compile_context>
chip_gen: v7x
topology: tpu7x:2x2x1
jax: 0.10.0
libtpu: 0.0.40
codegen_flags: <defaults>
</compile_context>

<pallas_src>
import jax
import jax.numpy as jnp
from jax import lax
from jax.experimental import pallas as pl
from jax.experimental.pallas import tpu as pltpu


def _self_att_resnet_kernel(x_ref, wp_ref, bp_ref, o_ref):
    x = x_ref[...]                                               # (N, D)
    d = x.shape[-1]

    # One fused projection: [Q*scale | K | V.Wd2^T | x.Wd1^T + bd] -> (N, 4D).
    proj = (jnp.dot(x, wp_ref[...], preferred_element_type=jnp.float32)
            + bp_ref[...])                                       # (N, 4D)
    q   = proj[:, 0 * d:1 * d]      # already scaled by 1/sqrt(D) via folded weight
    k   = proj[:, 1 * d:2 * d]
    vd  = proj[:, 2 * d:3 * d]      # value already right-multiplied by Wd2^T
    res = proj[:, 3 * d:4 * d]      # residual half of dense: x @ Wd1^T + bd

    # scores = Q K^T: contract dim 1 of both operands (no materialized k.T).
    scores = lax.dot_general(q, k, (((1,), (1,)), ((), ())),
                             preferred_element_type=jnp.float32)  # (N, N)

    # softmax over keys (dim=1)
    scores = scores - jnp.max(scores, axis=1, keepdims=True)
    e = jnp.exp(scores)
    # approx=True (EUP vrcp) was evaluated but kept exact to hold the 1e-4
    # reference tolerance; its ~2^-12 relative error is borderline here.
    attn = e * pl.reciprocal(jnp.sum(e, axis=1, keepdims=True), approx=False)

    # Final dense layer is pre-folded: out = relu(res + attn @ vd).
    out = res + jnp.dot(attn, vd, preferred_element_type=jnp.float32)  # (N, D)
    o_ref[...] = jnp.maximum(out, 0.0).astype(o_ref.dtype)


def prepare_params(params):
    """One-time transform from torch-convention params to kernel-ready layout.

    Hoisted out of the per-call path; folds the attention scale, the value
    projection, and BOTH halves of the dense layer into one (D, 4D) weight.
    """
    d = params["Wq"].shape[0]
    scale = jnp.float32(1.0 / (d ** 0.5))
    wd1 = params["Wd"][:, :d]        # (D, D) acts on the x half of cat
    wd2 = params["Wd"][:, d:]        # (D, D) acts on the weighted half
    w_proj = jnp.concatenate(
        [params["Wq"].T * scale,                     # Q (scale folded)
         params["Wk"].T,                             # K
         params["Wv"].T @ wd2.T,                     # V folded with dense half
         wd1.T],                                     # residual dense half
        axis=1).astype(jnp.float32)                  # (D, 4D)
    b_proj = jnp.concatenate(
        [params["bq"] * scale,
         params["bk"],
         params["bv"] @ wd2.T,
         params["bd"]]).reshape(1, 4 * d).astype(jnp.float32)    # (1, 4D)
    return {"w_proj": w_proj, "b_proj": b_proj}


def self_att_resnet(x, prepped):
    """x: (N, D) single problem, or (B, N, D) batch of independent problems."""
    squeeze = x.ndim == 2
    if squeeze:
        x = x[None]
    b, n, d = x.shape

    # TODO(synk): for large D, cast matmul operands to bf16 (keep f32 accum)
    # and tile N/D to multiples of (8, 128) for full MXU utilization.
    out = pl.pallas_call(
        _self_att_resnet_kernel,
        out_shape=jax.ShapeDtypeStruct((b, n, d), jnp.float32),
        grid=(b,),
        in_specs=[
            pl.BlockSpec((None, n, d), lambda i: (i, 0, 0)),      # x: per-problem
            pl.BlockSpec((d, 4 * d), lambda i: (0, 0)),           # fused weight stays
            pl.BlockSpec((1, 4 * d), lambda i: (0, 0)),           # VMEM-resident
        ],
        out_specs=pl.BlockSpec((None, n, d), lambda i: (i, 0, 0)),
        compiler_params=pltpu.CompilerParams(
            dimension_semantics=("parallel",)),                   # both TCs on v7x
    )(x, prepped["w_proj"], prepped["b_proj"])

    return out[0] if squeeze else out


def _reference(x, params):
    """Pure-JAX reference mirroring the PyTorch forward."""
    d = x.shape[1]
    q = x @ params["Wq"].T + params["bq"]
    k = x @ params["Wk"].T + params["bk"]
    v = x @ params["Wv"].T + params["bv"]
    scores = (q @ k.T) / (d ** 0.5)
    attn = jax.nn.softmax(scores, axis=1)
    weighted = attn @ v
    cat = jnp.concatenate([x, weighted], axis=1)
    out = cat @ params["Wd"].T + params["bd"]
    return jax.nn.relu(out)


def _init_params(key, input_dim):
    """Deterministic synthetic init (torch Linear shapes: W=(out,in), b=(out,))."""
    keys = jax.random.split(key, 8)
    s = 1.0 / (input_dim ** 0.5)
    return {
        "Wq": jax.random.uniform(keys[0], (input_dim, input_dim), jnp.float32, -s, s),
        "bq": jax.random.uniform(keys[1], (input_dim,), jnp.float32, -s, s),
        "Wk": jax.random.uniform(keys[2], (input_dim, input_dim), jnp.float32, -s, s),
        "bk": jax.random.uniform(keys[3], (input_dim,), jnp.float32, -s, s),
        "Wv": jax.random.uniform(keys[4], (input_dim, input_dim), jnp.float32, -s, s),
        "bv": jax.random.uniform(keys[5], (input_dim,), jnp.float32, -s, s),
        "Wd": jax.random.uniform(keys[6], (input_dim, 2 * input_dim), jnp.float32, -s, s),
        "bd": jax.random.uniform(keys[7], (input_dim,), jnp.float32, -s, s),
    }


if __name__ == "__main__":
    N, D = 8, 32                      # seq=8 tokens, hidden=32 features
    B = 4                             # batch of independent problems for the grid
    root = jax.random.PRNGKey(0)
    kx, kp = jax.random.split(root)
    params = _init_params(kp, D)
    prepped = prepare_params(params)  # one-time param prep, outside the hot path

    # Batched path: B independent (N, D) problems via the parallel grid.
    xb = jax.random.normal(kx, (B, N, D), jnp.float32)
    out_b = self_att_resnet(xb, prepped)
    jax.block_until_ready(out_b)
    ref_b = jax.vmap(lambda xi: _reference(xi, params))(xb)
    assert out_b.shape == (B, N, D)
    assert jnp.allclose(out_b, ref_b, atol=1e-4, rtol=1e-4), "batched mismatch"

    # Single-problem path: matches the PyTorch module's forward exactly.
    out1 = self_att_resnet(xb[0], prepped)
    jax.block_until_ready(out1)
    assert out1.shape == (N, D)
    assert jnp.allclose(out1, ref_b[0], atol=1e-4, rtol=1e-4), "single mismatch"

    print("KERNEL_OK")
</pallas_src>

<mosaic_0001>
module attributes {stable_mosaic.version = 11 : i64} {
  func.func @_self_att_resnet_kernel(%arg0: i32, %arg1: memref<1x8x32xf32, #tpu.memory_space<vmem>>, %arg2: memref<32x128xf32, #tpu.memory_space<vmem>>, %arg3: memref<1x128xf32, #tpu.memory_space<vmem>>, %arg4: memref<1x8x32xf32, #tpu.memory_space<vmem>>) attributes {dimension_semantics = [#tpu.dimension_semantics<parallel>], iteration_bounds = array<i64: 4>, scalar_prefetch = 0 : i64, scratch_operands = 0 : i64, tpu.core_type = #tpu.core_type<tc>, window_params = [{transform_indices = @transform_0, window_bounds = array<i64: 1, 8, 32>}, {pipeline_mode = #tpu.pipeline_mode<synchronous>, transform_indices = @transform_1, window_bounds = array<i64: 32, 128>}, {pipeline_mode = #tpu.pipeline_mode<synchronous>, transform_indices = @transform_2, window_bounds = array<i64: 1, 128>}, {transform_indices = @transform_3, window_bounds = array<i64: 1, 8, 32>}]} {
    %c0 = arith.constant 0 : index
    %c0_0 = arith.constant 0 : index
    %c0_1 = arith.constant 0 : index
    %0 = vector.load %arg1[%c0, %c0_0, %c0_1] : memref<1x8x32xf32, #tpu.memory_space<vmem>>, vector<1x8x32xf32>
    %1 = vector.shape_cast %0 : vector<1x8x32xf32> to vector<8x32xf32>
    %c0_2 = arith.constant 0 : index
    %c0_3 = arith.constant 0 : index
    %2 = vector.load %arg2[%c0_2, %c0_3] : memref<32x128xf32, #tpu.memory_space<vmem>>, vector<32x128xf32>
    %cst = arith.constant dense<0.000000e+00> : vector<8x128xf32>
    %3 = tpu.matmul %1, %2, %cst {dimension_numbers = #tpu.dot_dimension_numbers<[1], [0], [0], [1], [0, 0, 1, 1], [], []>} : vector<8x32xf32>, vector<32x128xf32>, vector<8x128xf32> -> vector<8x128xf32>
    %c0_4 = arith.constant 0 : index
    %c0_5 = arith.constant 0 : index
    %4 = vector.load %arg3[%c0_4, %c0_5] : memref<1x128xf32, #tpu.memory_space<vmem>>, vector<1x128xf32>
    %5 = vector.broadcast %4 : vector<1x128xf32> to vector<8x128xf32>
    %6 = arith.addf %3, %5 : vector<8x128xf32>
    %7 = vector.extract_strided_slice %6 {offsets = [0, 0], sizes = [8, 32], strides = [1, 1]} : vector<8x128xf32> to vector<8x32xf32>
    %8 = vector.extract_strided_slice %6 {offsets = [0, 32], sizes = [8, 32], strides = [1, 1]} : vector<8x128xf32> to vector<8x32xf32>
    %9 = vector.extract_strided_slice %6 {offsets = [0, 64], sizes = [8, 32], strides = [1, 1]} : vector<8x128xf32> to vector<8x32xf32>
    %10 = vector.extract_strided_slice %6 {offsets = [0, 96], sizes = [8, 32], strides = [1, 1]} : vector<8x128xf32> to vector<8x32xf32>
    %cst_6 = arith.constant dense<0.000000e+00> : vector<8x8xf32>
    %11 = tpu.matmul %7, %8, %cst_6 {dimension_numbers = #tpu.dot_dimension_numbers<[1], [1], [0], [0], [0, 0, 1, 0], [], []>} : vector<8x32xf32>, vector<8x32xf32>, vector<8x8xf32> -> vector<8x8xf32>
    %cst_7 = arith.constant dense<0xFF800000> : vector<8xf32>
    %12 = vector.multi_reduction <maximumf>, %11, %cst_7 [1] : vector<8x8xf32> to vector<8xf32>
    %13 = vector.shape_cast %12 : vector<8xf32> to vector<8x1xf32>
    %14 = vector.broadcast %13 : vector<8x1xf32> to vector<8x8xf32>
    %15 = arith.subf %11, %14 : vector<8x8xf32>
    %16 = math.exp %15 : vector<8x8xf32>
    %cst_8 = arith.constant dense<0.000000e+00> : vector<8xf32>
    %17 = vector.multi_reduction <add>, %16, %cst_8 [1] : vector<8x8xf32> to vector<8xf32>
    %18 = vector.shape_cast %17 : vector<8xf32> to vector<8x1xf32>
    %19 = tpu.reciprocal %18 : vector<8x1xf32> -> vector<8x1xf32>
    %20 = vector.broadcast %19 : vector<8x1xf32> to vector<8x8xf32>
    %21 = arith.mulf %16, %20 : vector<8x8xf32>
    %cst_9 = arith.constant dense<0.000000e+00> : vector<8x32xf32>
    %22 = tpu.matmul %21, %9, %cst_9 {dimension_numbers = #tpu.dot_dimension_numbers<[1], [0], [0], [1], [0, 0, 1, 1], [], []>} : vector<8x8xf32>, vector<8x32xf32>, vector<8x32xf32> -> vector<8x32xf32>
    %23 = arith.addf %10, %22 : vector<8x32xf32>
    %cst_10 = arith.constant 0.000000e+00 : f32
    %24 = vector.broadcast %cst_10 : f32 to vector<8x32xf32>
    %25 = arith.maximumf %23, %24 : vector<8x32xf32>
    %c0_11 = arith.constant 0 : index
    %c0_12 = arith.constant 0 : index
    %c0_13 = arith.constant 0 : index
    %26 = vector.load %arg4[%c0_11, %c0_12, %c0_13] : memref<1x8x32xf32, #tpu.memory_space<vmem>>, vector<1x8x32xf32>
    %27 = vector.shape_cast %26 : vector<1x8x32xf32> to vector<8x32xf32>
    %28 = vector.shape_cast %25 : vector<8x32xf32> to vector<1x8x32xf32>
    tpu.vector_store %arg4[%c0_11, %c0_12, %c0_13], %28 {strides = array<i32>} : memref<1x8x32xf32, #tpu.memory_space<vmem>>, vector<1x8x32xf32>,
    return
  }
  func.func @transform_0(%arg0: i32) -> (i32, i32, i32) {
    %c0_i32 = arith.constant 0 : i32
    %c0_i32_0 = arith.constant 0 : i32
    %c0_i32_1 = arith.constant 0 : i32
    return %arg0, %c0_i32, %c0_i32_0 : i32, i32, i32
  }
  func.func @transform_1(%arg0: i32) -> (i32, i32) {
    %c0_i32 = arith.constant 0 : i32
    %c0_i32_0 = arith.constant 0 : i32
    %c0_i32_1 = arith.constant 0 : i32
    return %c0_i32, %c0_i32_0 : i32, i32
  }
  func.func @transform_2(%arg0: i32) -> (i32, i32) {
    %c0_i32 = arith.constant 0 : i32
    %c0_i32_0 = arith.constant 0 : i32
    %c0_i32_1 = arith.constant 0 : i32
    return %c0_i32, %c0_i32_0 : i32, i32
  }
  func.func @transform_3(%arg0: i32) -> (i32, i32, i32) {
    %c0_i32 = arith.constant 0 : i32
    %c0_i32_0 = arith.constant 0 : i32
    %c0_i32_1 = arith.constant 0 : i32
    return %arg0, %c0_i32, %c0_i32_0 : i32, i32, i32
  }
}

</mosaic_0001>

<bundles_post_ra>
// kernel: tpu_custom_call.1
= control target key start
LH: loop header
LB: loop body
LE: loop exit
PB: predicated region body
PF: predicated region fallthrough
CT: control target
= control target key end

     0   :  { %8 = vsyncpa [#allocation3], 0  ;;  %s1046_s0 = inlined_call_operand.hbm [shape: f32[4,8,32], index: 0, kind: input, shape index: {}]   ;;  %s1047_s1 = inlined_call_operand.hbm [shape: f32[32,128], index: 1, kind: input, shape index: {}]   ;;  %s1048_s2 = inlined_call_operand.vmem [shape: f32[1,128], index: 2, kind: input, shape index: {}]   ;;  %s1049_s3 = inlined_call_operand.hbm [shape: f32[4,8,32], index: 3, kind: output, shape index: {}]  }
   0x1   :  { %10 = vsyncpa [#allocation3 + $0x1], 0 }
   0x2   :  { %11 = vsyncpa [#allocation6], 0 }
   0x3   :  { %12 = vsyncpa [#allocation4], 0 }
   0x4   :  { %14 = vsyncpa [#allocation4 + $0x1], 0  ;;  %s842_s12 = smov 0   ;;  %s844_s13 = smov 0  }
   0x5   :  { %s846_s14 = smov 0   ;;  %s848_s15 = smov 0  }
   0x6 LB: > { %s863_s16 = sadd.s32 4294967295, %s809_s15   ;;  %s557_s17 = sadd.s32 4294967294, %s809_s15   ;;  %s809_s15 = sphi %s848_s15, %s1068_s15   ;;  %s805_s14 = sphi %s846_s14, %s1067_s14   ;;  %s801_s13 = sphi %s844_s13, %s1066_s13   ;;  %s797_s12 = sphi %s842_s12, %s1065_s12  }
   0x7   : > { %p40_p0 = scmp.ne.s32.totalorder %s801_s13, %s797_s12  ;;  %p1050_p1 = scmp.eq.s32.totalorder %s863_s16, 0 }
   0x8   : > { %p112_p3 = scmp.eq.s32.totalorder %s557_s17, 3  ;;  %p558_p5 = scmp.ge.s32.totalorder %s809_s15, 1 }
   0x9   : > { %p872_p4 = por %p1050_p1, %p40_p0  ;;  %p119_p7 = scmp.lt.s32.totalorder %s809_s15, 5 }
   0xa   : > { %p877_p6 = por %p112_p3, %p40_p0  ;;  %s811_s21 = smov [#allocation5]  }
   0xb   : > { %s1053_s18 = scalar_select %p872_p4, 1, 0 }
   0xc   : > { %s1054_s19 = scalar_select %p877_p6, 1, 0 }
   0xd   : > { %p882_p8 = pnand %p558_p5, %p119_p7  ;;  %s131_s22 = sshll.u32 %s811_s21, 4  ;;  %s132_s22 = int_to_ptr.vmem [resolvable:$true] %s131_s22 }
   0xe   : > { %s895_s24 = sadd.s32 1, %s809_s15   ;;  %s27_s25 = sadd.s32 1, %s805_s14 }
   0xf   : > { %s1055_s20 = scalar_select %p882_p8, 1, 0 }
  0x10   : > { %p620_p9 = pneg %p882_p8  ;;  %s24_s26 = ssub.s32 %s809_s15, %s895_s24 }
  0x11   : > { %s681_s29 = scalar_lea.hbm %s1047_s1, 512 }
  0x12   : > { %p890_p10 = pnand %p620_p9, %p1050_p1  ;;  %p682_p11 = scmp.ne.s32.totalorder %s1047_s1, %s681_s29 }
  0x13   : > { %p688_p3 = scmp.lt.u32.totalorder %s681_s29, %s1047_s1 }
  0x14   : > { %p683_p12 = pneg %p890_p10 }
  0x16   : > { %p684_p13 = pnand %p683_p12, %p682_p11 }
  0x18   : > { %p685_p0 = pneg %p684_p13 }
  0x1a   : > { %p690_p5 = pnand %p688_p3, %p685_p0 }
  0x1c   : > { %693 = shalt.err (!%p690_p5)
}
  0x1d   : > { %s694_s7 = scalar_lea.vmem %s132_s22, 512  ;;  %p702_p2 = scmp.lt.s32.totalorder %s132_s22, %s132_s22 }
  0x1e   : > { %p695_p7 = scmp.ne.s32.totalorder %s132_s22, %s694_s7  ;;  %p703_p6 = scmp.lt.s32.totalorder %s694_s7, %s694_s7 }
  0x20   : > { %p697_p9 = pnand %p695_p7, %p683_p12  ;;  %p704_p4 = por %p703_p6, %p702_p2 }
  0x22   : > { %p698_p1 = pneg %p697_p9 }
  0x24   : > { %p705_p8 = pnand %p704_p4, %p698_p1 }
  0x26   : > { %708 = shalt.err (!%p705_p8)
}
  0x27   : > { %s812_s8 = smov 128   ;;  %s813_s9 = smov 8  }
  0x28   : > { %623 = dma.hbm_to_vmem [thread:$0]  (!%p890_p10), %s1047_s1, 512, %s132_s22, [#allocation6], %s812_s8, %s812_s8, %s813_s9  }
  0x29   : > { %p25_p11 = scmp.eq.s32.totalorder %s24_s26, 0  ;;  %p34_p2 = scmp.ne.s32.totalorder %s805_s14, %s801_s13 }
  0x2a   : > { %p35_p1 = scmp.eq.s32.totalorder %s809_s15, 0  ;;  %p633_p4 = scmp.lt.s32.totalorder %s809_s15, 4 }
  0x2b   : > { %s921_s17 = scalar_select %p25_p11, %s805_s14, %s27_s25  }
  0x2c   : > { %p36_p6 = por %p35_p1, %p34_p2  ;;  %p1057_p8 = scmp.eq.s32.totalorder %s863_s16, 3 }
  0x2d   : > { %s148_s27 = sand.u32 1, %s805_s14   ;;  %s562_s28 = sshll.u32 %s809_s15, 7 }
  0x2e   : > { %p925_p12 = por %p1057_p8, %p34_p2  ;;  %s561_s29 = sshll.u32 %s148_s27, 3 }
  0x2f   : > { %s934_s4 = scalar_lea.hbm %s1046_s0, %s562_s28  ;;  %s152_s22 = scalar_lea.vmem [#allocation2], %s561_s29 }
  0x30   : > { %s159_s25 = sshll.u32 %s152_s22, 4  ;;  %p936_p10 = pnand %p633_p4, %p36_p6  ;;  %s940_s25 = int_to_ptr.vmem [resolvable:$true] %s159_s25 }
  0x31   : > { %s149_s5 = scalar_lea.sflag [#allocation3], %s148_s27  ;;  %s709_s6 = scalar_lea.hbm %s934_s4, 128 }
  0x32   : > { %p710_p13 = scmp.ne.s32.totalorder %s934_s4, %s709_s6  ;;  %p711_p0 = pneg %p936_p10 }
  0x33   : > { %s714_s9 = scalar_lea.hbm %s1046_s0, 512  ;;  %p715_p7 = scmp.lt.u32.totalorder %s934_s4, %s1046_s0 }
  0x34   : > { %p712_p3 = pnand %p711_p0, %p710_p13  ;;  %p716_p9 = scmp.lt.u32.totalorder %s714_s9, %s709_s6 }
  0x35   : > { %p718_p2 = scmp.lt.u32.totalorder %s709_s6, %s934_s4 }
  0x36   : > { %p713_p5 = pneg %p712_p3  ;;  %p717_p11 = por %p716_p9, %p715_p7 }
  0x38   : > { %p719_p1 = por %p718_p2, %p717_p11 }
  0x3a   : > { %p720_p4 = pnand %p719_p1, %p713_p5 }
  0x3c   : > { %723 = shalt.err (!%p720_p4)
}
  0x3d   : > { %s724_s27 = scalar_lea.vmem %s940_s25, 128  ;;  %s814_s28 = smov [#allocation2]  }
  0x3e   : > { %p725_p6 = scmp.ne.s32.totalorder %s940_s25, %s724_s27  ;;  %s729_s29 = sshll.u32 %s814_s28, 4  ;;  %s730_s29 = int_to_ptr.vmem [resolvable:$false] %s729_s29 }
  0x3f   : > { %s731_s23 = scalar_lea.vmem %s730_s29, 256  ;;  %p732_p3 = scmp.lt.s32.totalorder %s940_s25, %s730_s29 }
  0x40   : > { %p727_p8 = pnand %p725_p6, %p711_p0  ;;  %p733_p7 = scmp.lt.s32.totalorder %s731_s23, %s724_s27 }
  0x42   : > { %p728_p13 = pneg %p727_p8  ;;  %p734_p9 = por %p733_p7, %p732_p3 }
  0x44   : > { %p735_p11 = pnand %p734_p9, %p728_p13 }
  0x46   : > { %738 = shalt.err (!%p735_p11)
}
  0x47   : > { %627 = dma.hbm_to_vmem [thread:$0]  (!%p936_p10), %s934_s4, 128, %s940_s25, %s149_s5  }
  0x48   : > { %p1060_p5 = scmp.ne.s32.totalorder %s1055_s20, 0 }
  0x49   : > { %s970_s30 = sand.u32 (!%p1060_p5), 1, %s801_s13   ;;  %p1061_p0 = scmp.ne.s32.totalorder (!%p1060_p5), %s1053_s18, 0 }
  0x4a   : > { %168 = sbr.rel (%p1060_p5) target bundleno = 1413 (0x585), region = 32  ;;  %s564_s22 = sshll.u32 (!%p1060_p5), %s970_s30, 3 }
  0x4b   : > { %s171_s6 = scalar_lea.sflag (!%p1060_p5), [#allocation3], %s970_s30  ;;  %s174_s7 = scalar_lea.vmem (!%p1060_p5), [#allocation2], %s564_s22 }
  0x51   : > { %784 = dma.done.wait (%p1061_p0), %s171_s6, 128  }
  0x52   : > { %786 = vsyncadd (%p1061_p0), %s171_s6, 4294967168  ;;  %p1062_p10 = scmp.eq.s32.totalorder %s863_s16, 0 }
  0x54   : > { %788 = dma.done.wait (%p1062_p10), [#allocation6], 512   ;;  %p1063_p2 = pmov %p1062_p10 }
  0x55   : > { %v815_v0 = vmov 0.0|0.0   ;;  %vm816_vm0 = vmmov 0   ;;  %v817_v1 = vmov 0.0   ;;  %v202_v2 = vld [vmem:[#allocation5] sm:$0xff]  ;;  %v203_v3 = vld [vmem:[#allocation5 + $0x8] sm:$0xff]  ;;  %v204_v4 = vld [vmem:[#allocation5 + $0x10] sm:$0xff] }
  0x56   : > { %790 = vsyncadd (%p1063_p2), [#allocation6], 4294966784  ;;  %606 = vmatprep.subr.bf16.mxu0 %v815_v0  ;;  %593 = vmatprep.mubr.msk.f32.mxu0 %vm816_vm0, %v817_v1  ;;  %v607_v5 = vpack.c.bf16 %v203_v3, %v202_v2  ;;  %v205_v6 = vld [vmem:[#allocation5 + $0x18] sm:$0xff]  ;;  %vm213_vm1 = vcmask 261120   ;;  %v567_v9 = vld [vmem:[%s1048_s2] ss:$0 sm:$0xff] }
  0x57   : > { %596 = vmatprep.subr.mxu1 %v817_v1  ;;  %598 = vmatprep.mubr.msk.f32.mxu1 %vm816_vm0, %v817_v1  ;;  %v610_v7 = vpack.c.bf16 %v205_v6, %v204_v4  ;;  %v201_v8 = vld [vmem:[%s174_s7] sm:$0xff]  ;;  %s818_s4 = smov 96   ;;  %vm364_vm2 = vcmask 64512   ;;  %s819_s25 = smov 64  }
  0x58   : > { %608 = vmatpush3.bf16.msra.mxu0 %v607_v5  ;;  %s820_s26 = smov 32   ;;  %s573_s5 = sshll.u32 %s863_s16, 7 }
  0x59   : > { %609 = vmatprep.subr.bf16.mxu0 %v815_v0  ;;  %s200_s8 = scalar_lea.vmem [#allocation7], %s564_s22  ;;  %s1002_s27 = scalar_lea.hbm %s1049_s3, %s573_s5 }
  0x5a   : > { %s477_s9 = sshll.u32 %s200_s8, 4  ;;  %s464_s28 = scalar_lea.sflag [#allocation4], %s970_s30  ;;  %s1004_s9 = int_to_ptr.vmem [resolvable:$true] %s477_s9 }
  0x5b   : > { %s739_s29 = scalar_lea.vmem %s1004_s9, 128  ;;  %s821_s16 = smov [#allocation7]  }
  0x5c   : > { %611 = vmatpush3.bf16.msra.mxu0 %v610_v7  ;;  %p740_p1 = scmp.ne.s32.totalorder %s1004_s9, %s739_s29  ;;  %s743_s23 = sshll.u32 %s821_s16, 4  ;;  %s744_s23 = int_to_ptr.vmem [resolvable:$false] %s743_s23 }
  0x5d   : > { %s745_s22 = scalar_lea.vmem %s744_s23, 256  ;;  %p746_p8 = scmp.lt.s32.totalorder %s1004_s9, %s744_s23 }
  0x5e   : > { %p741_p4 = pnand %p740_p1, %p925_p12  ;;  %p747_p13 = scmp.lt.s32.totalorder %s745_s22, %s739_s29 }
  0x5f   : > { %594 = vmatmul.mubr.msk.f32.vlgmr.msra.gmra.mrb[0].mxu0 %vm213_vm1, %v201_v8 }
  0x60   : > { %p742_p6 = pneg %p741_p4  ;;  %p748_p3 = por %p747_p13, %p746_p8 }
  0x62   : > { %p749_p7 = pnand %p748_p3, %p742_p6 }
 0x132   : > { %v283_v10 = vpop.f32.mrb[0].mxu0 }
 0x133   : > { %v284_v11 = vadd.f32 %v567_v9, %v283_v10  ;;  %v595_v12 = vpop.f32.mrb[1].mxu0 }
 0x135   : > { %288 = vrot.lane.b32.xlu0 %v284_v11, %s818_s4 }
 0x1a7   : > { %v289_v13 = vpop.permute.xlu0 %288 }
 0x1a8   : > { %597 = vmatpush3.xpose.msk.msra.mxu1 %vm213_vm1, %v289_v13 }
 0x1a9   : > { %601 = vmatprep.subr.mxu1 %v817_v1 }
 0x1ab   : > { %599 = vmatmul.mubr.msk.f32.vlgmr.msra.gmra.mrb[0].mxu1 %vm213_vm1, %v284_v11 }
 0x1ac   : > { %603 = vmatprep.mubr.msk.f32.mxu1 %vm816_vm0, %v817_v1 }
 0x27e   : > { %v360_v14 = vpop.f32.mrb[0].mxu1 }
 0x27f   : > { %v600_v15 = vpop.f32.mrb[1].mxu1  ;;  %v365_v16 = vsel %vm364_vm2, %v360_v14, -inf }
 0x280   : > { %366 = vmax.xlane.f32.xlu0 %v365_v16 }
 0x30d   : > { %v367_v17 = vpop.xlane.xlu0 %366 }
 0x30e   : > { %v368_v18 = vsub.f32 %v360_v14, %v367_v17 }
 0x310   : > { %v369_v19 = vmul.f32 1.442695, %v368_v18 }
 0x312   : > { %677 = vpow2.f32 %v369_v19 }
 0x31c   : > { %v678_v20 = vpop.eup %677 }
 0x31d   : > { %v371_v21 = vsel %vm364_vm2, %v678_v20, 0.0 }
 0x31e   : > { %372 = vadd.xlane.f32.xlu1 %v371_v21 }
 0x32f   : > { %376 = vrot.lane.b32.xlu1 %v284_v11, %s819_s25 }
 0x3ab   : > { %v373_v22 = vpop.xlane.xlu1 %372 }
 0x3ac   : > { %679 = vrcp.f32 %v373_v22 }
 0x3af   : > { %v377_v23 = vpop.permute.xlu1 %376 }
 0x3b0   : > { %602 = vmatpush3.msra.mxu1 %v377_v23 }
 0x3b6   : > { %v680_v24 = vpop.eup %679 }
 0x3b7   : > { %v375_v25 = vmul.f32 %v680_v24, %v678_v20 }
 0x3b9   : > { %604 = vmatmul.mubr.msk.f32.vlgmr.msra.gmra.mrb[2].mxu1 %vm364_vm2, %v375_v25 }
 0x48c   : > { %v448_v26 = vpop.f32.mrb[2].mxu1 }
 0x48d   : > { %453 = vrot.lane.b32.xlu1 %v448_v26, %s818_s4  ;;  %v605_v27 = vpop.f32.mrb[3].mxu1 }
 0x4ff   : > { %v454_v28 = vpop.permute.xlu1 %453 }
 0x500   : > { %v456_v29 = vadd.f32 %v454_v28, %v284_v11 }
 0x502   : > { %v457_v30 = vmax.f32 %v456_v29, 0.0 }
 0x504   : > { %459 = vrot.lane.b32.xlu1 %v457_v30, %s820_s26 }
 0x576   : > { %v460_v31 = vpop.permute.xlu1 %459 }
 0x577   : > { %462 = vst.msk [vmem:[%s200_s8] sm:$0xff] %vm213_vm1, %v460_v31 }
 0x578   : > { %752 = shalt.err (!%p749_p7)
}
 0x579   : > { %s753_s30 = scalar_lea.hbm %s1002_s27, 128  ;;  %s757_s18 = scalar_lea.hbm %s1049_s3, 512 }
 0x57a   : > { %p754_p9 = scmp.ne.s32.totalorder %s1002_s27, %s753_s30  ;;  %p758_p0 = scmp.lt.u32.totalorder %s1002_s27, %s1049_s3 }
 0x57b   : > { %p759_p10 = scmp.lt.u32.totalorder %s757_s18, %s753_s30  ;;  %p761_p1 = scmp.lt.u32.totalorder %s753_s30, %s1002_s27 }
 0x57c   : > { %p755_p11 = pnand %p754_p9, %p925_p12 }
 0x57d   : > { %p760_p2 = por %p759_p10, %p758_p0 }
 0x57e   : > { %p756_p5 = pneg %p755_p11 }
 0x57f   : > { %p762_p4 = por %p761_p1, %p760_p2 }
 0x581   : > { %p763_p6 = pnand %p762_p4, %p756_p5 }
 0x583   : > { %766 = shalt.err (!%p763_p6)
}
 0x584   : > { %618 = dma.vmem_to_hbm [thread:$0]  (%p925_p12), %s1004_s9, 128, %s1002_s27, %s464_s28  }
 0x585 PF: > { %p635_p8 = scmp.ge.s32.totalorder %s809_s15, 2  ;;  %s489_s25 = sand.u32 1, %s797_s12  }
 0x586   : > { %p1064_p13 = scmp.ne.s32.totalorder %s1054_s19, 0  ;;  %s490_s26 = scalar_lea.sflag [#allocation4], %s489_s25 }
 0x588   : > { %p629_p3 = pnand %p635_p8, %p1064_p13 }
 0x58a   : > { %792 = dma.done.wait (!%p629_p3), %s490_s26, 128  }
 0x58b   : > { %794 = vsyncadd (!%p629_p3), %s490_s26, 4294967168  ;;  %p17_p7 = scmp.ge.s32.totalorder %s895_s24, 6   ;;  %s1065_s12 = smov %s801_s13 }
 0x58c   : > { %s1066_s13 = smov %s805_s14  ;;  %s1067_s14 = smov %s921_s17 }
 0x58d   : > { %s1068_s15 = smov %s895_s24  ;;  %19 = sbr.rel (!%p17_p7) target bundleno = 6 (0x6), region = 81 }
 0x594   :  { %495 = vsyncpa [#allocation3], 1 }
 0x595   :  { %497 = vsyncpa [#allocation3 + $0x1], 1 }
 0x596   :  { %498 = vsyncpa [#allocation6], 1 }
 0x597   :  { %499 = vsyncpa [#allocation4], 1 }
 0x598   :  { %501 = vsyncpa [#allocation4 + $0x1], 1 }

</bundles_post_ra>
